<compile_context>
chip_gen: v7x
topology: tpu7x:2x2x1
jax: 0.10.0
libtpu: 0.0.40
codegen_flags: <defaults>
</compile_context>

<pallas_src>
import functools

import jax
import jax.numpy as jnp
from jax import lax
from jax.experimental import pallas as pl
from jax.experimental.pallas import tpu as pltpu


def conv_relu_blur_kernel(x_ref, a_ref, b_ref, v_ref, s_ref, o_ref, *, KH):
    # x_ref: (Bt, Hp2, W*Cin)          bf16  H-padded input, lane-dense over (W, Cin)
    # a_ref: (KH*W*Cin, Wc*Cout)       bf16  banded conv weight, KH taps fused on the contraction
    # b_ref: (1, Wc*Cout)              f32   bias pre-tiled across W
    # v_ref: (Ho, Hc)                  bf16  vertical [1,2,1]/4 blur + stride-2 (per image)
    # s_ref: (Wc*Cout, Wo*Cout)        bf16  horizontal [1,2,1]/4 blur + stride-2 (identity over C)
    # o_ref: (Bt, Ho, Wo*Cout)         bf16
    Bt, Hp2, WCin = x_ref.shape
    Ho, Hc = v_ref.shape

    # Assemble the KH vertically-shifted views once (lane concat), then ONE fused MXU matmul
    # with f32 accumulation.  Avoids KH per-tap relayout copies and triples contraction depth.
    xk = jnp.concatenate([x_ref[:, kh:kh + Hc, :] for kh in range(KH)], axis=2)   # (Bt, Hc, KH*W*Cin)
    acc = jnp.dot(xk.reshape(Bt * Hc, KH * WCin), a_ref[...],
                  preferred_element_type=jnp.float32)                             # (Bt*Hc, Wc*Cout)

    # bias + ReLU: one lane-dense VPU pass.
    y = jnp.maximum(acc + b_ref[...], 0.0).astype(jnp.bfloat16)                   # (Bt*Hc, Wc*Cout)

    # BlurPool2d(k=3, stride=2): per-image vertical banded matmul, then horizontal banded matmul
    # (stride-2 subsample happens inside both matrices -> 4x less output writeback).
    for b in range(Bt):
        u = jnp.dot(v_ref[...], y[b * Hc:(b + 1) * Hc, :],
                    preferred_element_type=jnp.float32).astype(jnp.bfloat16)      # (Ho, Wc*Cout)
        o_ref[b] = jnp.dot(u, s_ref[...],
                           preferred_element_type=jnp.float32).astype(o_ref.dtype)  # (Ho, Wo*Cout)


def _round_up(x, m):
    return (x + m - 1) // m * m


def _vmem_bytes(bt, Hp2, WCin, Hc, KHWCin, WcCout, Ho, WoCout):
    """Layout-padded VMEM footprint estimate for one grid step (includes double buffers)."""
    bf, f32 = 2, 4
    r = _round_up
    inp = 2 * bt * r(Hp2, 16) * r(WCin, 128) * bf            # input block, 2x pipeline buffers
    out = 2 * bt * r(Ho, 16) * r(WoCout, 128) * bf           # bf16 output block, 2x buffers
    consts = 2 * (r(KHWCin, 16) * r(WcCout, 128) * bf        # A (grid-invariant; conservatively 2x)
                  + 8 * r(WcCout, 128) * f32                 # bias
                  + r(Ho, 16) * r(Hc, 128) * bf              # V1
                  + r(WcCout, 16) * r(WoCout, 128) * bf)     # S
    inter = (bt * r(Hc, 16) * r(KHWCin, 128) * bf            # xk (assembled shifted views)
             + r(bt * Hc, 8) * r(WcCout, 128) * f32          # f32 conv accumulator
             + r(bt * Hc, 16) * r(WcCout, 128) * bf          # y (bias + ReLU)
             + r(Ho, 8) * r(WcCout, 128) * f32)              # per-image vertical-blur intermediate
    return inp + out + consts + inter


def _pick_batch_tile(B, footprint_fn, budget_bytes=20 << 20):
    """Largest divisor of B under the VMEM budget, capped so the grid keeps >= 2 parallel steps."""
    bt = B if B < 2 else max(1, min(B // 2, 16))
    while bt > 1 and (B % bt != 0 or footprint_fn(bt) > budget_bytes):
        bt -= 1
    return bt


@functools.partial(jax.jit, static_argnames=("stride", "conv_padding"))
def conv_blur_block(x_nchw, conv_w, conv_b, *, stride=2, conv_padding=1):
    """Forward of ConvBlurBlock(blur_position='after', blur_kernel_size=3). x_nchw: (B,Cin,H,W)."""
    B, Cin, H, W = x_nchw.shape
    Cout, _, KH, KW = conv_w.shape
    pc = conv_padding
    Hp2 = H + 2 * pc                                   # only H is physically padded
    Hc, Wc = Hp2 - KH + 1, W + 2 * pc - KW + 1         # stride-1 conv output size
    pb = 1                                             # BlurPool2d padding for kernel_size=3
    Ho = (Hc + 2 * pb - 3) // stride + 1
    Wo = (Wc + 2 * pb - 3) // stride + 1

    # ---- glue: NCHW -> lane-dense (B, Hp2, W*Cin); pad H only (W zero-pad folded into A); bf16 ----
    x = jnp.transpose(x_nchw, (0, 2, 3, 1))
    xp = jnp.pad(x, ((0, 0), (pc, pc), (0, 0), (0, 0)))
    xp = xp.reshape(B, Hp2, W * Cin).astype(jnp.bfloat16)

    # ---- banded conv weight A: (KH*W*Cin, Wc*Cout); W zero-padding folded in (boundary taps 0) ----
    w_hwio = jnp.transpose(conv_w, (2, 3, 1, 0)).astype(jnp.float32)      # (KH, KW, Cin, Cout)
    wi = jnp.arange(W)[:, None]                                           # input column
    wo_ = jnp.arange(Wc)[None, :]                                         # output column
    d = wi - wo_ + pc                                                     # kw tap index
    band = jnp.where(((d >= 0) & (d < KW))[None, :, :, None, None],
                     w_hwio[:, jnp.clip(d, 0, KW - 1), :, :], 0.0)        # (KH, W, Wc, Cin, Cout)
    A = band.transpose(0, 1, 3, 2, 4).reshape(KH * W * Cin, Wc * Cout).astype(jnp.bfloat16)

    bias = jnp.tile(conv_b.astype(jnp.float32), Wc).reshape(1, Wc * Cout)

    # ---- blur (k=3, [1,2,1](x)[1,2,1]/16) + stride-2 as two small constant banded matrices ----
    k1 = jnp.array([1.0, 2.0, 1.0], jnp.float32) * 0.25                   # 1/4 per pass -> 1/16 total

    def blur_band(n_in, n_out):
        dd = jnp.arange(n_in)[:, None] - stride * jnp.arange(n_out)[None, :] + pb
        return jnp.where((dd >= 0) & (dd < 3), k1[jnp.clip(dd, 0, 2)], 0.0)   # (n_in, n_out)

    V1 = blur_band(Hc, Ho).T.astype(jnp.bfloat16)                         # (Ho, Hc) per image
    S = (blur_band(Wc, Wo)[:, None, :, None] *
         jnp.eye(Cout, dtype=jnp.float32)[None, :, None, :]
         ).reshape(Wc * Cout, Wo * Cout).astype(jnp.bfloat16)             # (Wc*Cout, Wo*Cout)

    # ---- tiling / VMEM budget ----
    fp_fn = lambda bt: _vmem_bytes(bt, Hp2, W * Cin, Hc, KH * W * Cin, Wc * Cout, Ho, Wo * Cout)
    Bt = _pick_batch_tile(B, fp_fn)
    vmem_limit = int(min(48 << 20, max(32 << 20, 2 * fp_fn(Bt))))

    kernel = functools.partial(conv_relu_blur_kernel, KH=KH)

    out3d = pl.pallas_call(
        kernel,
        out_shape=jax.ShapeDtypeStruct((B, Ho, Wo * Cout), jnp.bfloat16),
        grid_spec=pltpu.PrefetchScalarGridSpec(
            num_scalar_prefetch=0,
            grid=(B // Bt,),
            in_specs=[
                pl.BlockSpec((Bt, Hp2, W * Cin), lambda b: (b, 0, 0)),
                pl.BlockSpec((KH * W * Cin, Wc * Cout), lambda b: (0, 0)),
                pl.BlockSpec((1, Wc * Cout), lambda b: (0, 0)),
                pl.BlockSpec((Ho, Hc), lambda b: (0, 0)),
                pl.BlockSpec((Wc * Cout, Wo * Cout), lambda b: (0, 0)),
            ],
            out_specs=pl.BlockSpec((Bt, Ho, Wo * Cout), lambda b: (b, 0, 0)),
        ),
        compiler_params=pltpu.CompilerParams(
            dimension_semantics=("parallel",),
            vmem_limit_bytes=vmem_limit),
    )(xp, A, bias, V1, S)

    # glue: lane-dense (B, Ho, Wo*Cout) bf16 -> NCHW f32 (cast fused with the transpose pass)
    out = out3d.astype(jnp.float32).reshape(B, Ho, Wo, Cout)
    return jnp.transpose(out, (0, 3, 1, 2))


def reference(x_nchw, conv_w, conv_b, *, stride=2, conv_padding=1):
    """Pure-JAX reference reproducing the PyTorch forward (zero-padded conv + zero-padded blur)."""
    y = lax.conv_general_dilated(
        x_nchw, conv_w, window_strides=(1, 1),
        padding=((conv_padding, conv_padding), (conv_padding, conv_padding)),
        dimension_numbers=("NCHW", "OIHW", "NCHW"),
        precision=lax.Precision.HIGHEST)
    y = jnp.maximum(y + conv_b.reshape(1, -1, 1, 1), 0.0)
    B, C, H, W = y.shape
    b1 = jnp.array([1.0, 2.0, 1.0], jnp.float32)
    bk = (b1[:, None] * b1[None, :]) / 16.0
    z = lax.conv_general_dilated(
        y.reshape(B * C, 1, H, W), bk.reshape(1, 1, 3, 3),
        window_strides=(stride, stride), padding=((1, 1), (1, 1)),
        dimension_numbers=("NCHW", "OIHW", "NCHW"),
        precision=lax.Precision.HIGHEST)
    return z.reshape(B, C, z.shape[2], z.shape[3])


if __name__ == "__main__":
    # nn.Conv2d(4, 8, kernel_size=3, padding=1, stride=1); BlurPool2d(kernel_size=3, stride=2)
    B, Cin, Cout, H, W, K = 2, 4, 8, 16, 16, 3

    key = jax.random.PRNGKey(0)
    kx, kw, kb = jax.random.split(key, 3)
    x = jax.random.normal(kx, (B, Cin, H, W), jnp.float32)
    conv_w = 0.1 * jax.random.normal(kw, (Cout, Cin, K, K), jnp.float32)
    conv_b = 0.1 * jax.random.normal(kb, (Cout,), jnp.float32)

    out = jax.block_until_ready(conv_blur_block(x, conv_w, conv_b, stride=2, conv_padding=1))
    ref = jax.block_until_ready(reference(x, conv_w, conv_b, stride=2, conv_padding=1))

    assert out.shape == ref.shape == (B, Cout, H // 2, W // 2), (out.shape, ref.shape)
    max_err = float(jnp.max(jnp.abs(out - ref)))
    assert jnp.allclose(out, ref, atol=5e-2, rtol=5e-2), max_err

    print("KERNEL_OK")
</pallas_src>

<mosaic_0001>
module attributes {stable_mosaic.version = 11 : i64} {
  func.func @conv_relu_blur_kernel(%arg0: i32, %arg1: memref<1x18x64xbf16, #tpu.memory_space<vmem>>, %arg2: memref<192x128xbf16, #tpu.memory_space<vmem>>, %arg3: memref<1x128xf32, #tpu.memory_space<vmem>>, %arg4: memref<8x16xbf16, #tpu.memory_space<vmem>>, %arg5: memref<128x64xbf16, #tpu.memory_space<vmem>>, %arg6: memref<1x8x64xbf16, #tpu.memory_space<vmem>>) attributes {dimension_semantics = [#tpu.dimension_semantics<parallel>], iteration_bounds = array<i64: 2>, scalar_prefetch = 0 : i64, scratch_operands = 0 : i64, tpu.core_type = #tpu.core_type<tc>, window_params = [{transform_indices = @transform_0, window_bounds = array<i64: 1, 18, 64>}, {pipeline_mode = #tpu.pipeline_mode<synchronous>, transform_indices = @transform_1, window_bounds = array<i64: 192, 128>}, {pipeline_mode = #tpu.pipeline_mode<synchronous>, transform_indices = @transform_2, window_bounds = array<i64: 1, 128>}, {pipeline_mode = #tpu.pipeline_mode<synchronous>, transform_indices = @transform_3, window_bounds = array<i64: 8, 16>}, {pipeline_mode = #tpu.pipeline_mode<synchronous>, transform_indices = @transform_4, window_bounds = array<i64: 128, 64>}, {transform_indices = @transform_5, window_bounds = array<i64: 1, 8, 64>}]} {
    %c0 = arith.constant 0 : index
    %c0_0 = arith.constant 0 : index
    %c0_1 = arith.constant 0 : index
    %0 = vector.load %arg1[%c0, %c0_0, %c0_1] : memref<1x18x64xbf16, #tpu.memory_space<vmem>>, vector<1x16x64xbf16>
    %c0_2 = arith.constant 0 : index
    %c1 = arith.constant 1 : index
    %c0_3 = arith.constant 0 : index
    %1 = vector.load %arg1[%c0_2, %c1, %c0_3] : memref<1x18x64xbf16, #tpu.memory_space<vmem>>, vector<1x16x64xbf16>
    %c0_4 = arith.constant 0 : index
    %c2 = arith.constant 2 : index
    %c0_5 = arith.constant 0 : index
    %2 = vector.load %arg1[%c0_4, %c2, %c0_5] : memref<1x18x64xbf16, #tpu.memory_space<vmem>>, vector<1x16x64xbf16>
    %3 = tpu.concatenate %0, %1, %2 in 2 : vector<1x16x64xbf16>, vector<1x16x64xbf16>, vector<1x16x64xbf16> -> vector<1x16x192xbf16>
    %4 = vector.shape_cast %3 : vector<1x16x192xbf16> to vector<16x192xbf16>
    %c0_6 = arith.constant 0 : index
    %c0_7 = arith.constant 0 : index
    %5 = vector.load %arg2[%c0_6, %c0_7] : memref<192x128xbf16, #tpu.memory_space<vmem>>, vector<192x128xbf16>
    %cst = arith.constant dense<0.000000e+00> : vector<16x128xf32>
    %6 = tpu.matmul %4, %5, %cst {dimension_numbers = #tpu.dot_dimension_numbers<[1], [0], [0], [1], [0, 0, 1, 1], [], []>} : vector<16x192xbf16>, vector<192x128xbf16>, vector<16x128xf32> -> vector<16x128xf32>
    %c0_8 = arith.constant 0 : index
    %c0_9 = arith.constant 0 : index
    %7 = vector.load %arg3[%c0_8, %c0_9] : memref<1x128xf32, #tpu.memory_space<vmem>>, vector<1x128xf32>
    %8 = vector.broadcast %7 : vector<1x128xf32> to vector<16x128xf32>
    %9 = arith.addf %6, %8 : vector<16x128xf32>
    %cst_10 = arith.constant 0.000000e+00 : f32
    %10 = vector.broadcast %cst_10 : f32 to vector<16x128xf32>
    %11 = arith.maximumf %9, %10 : vector<16x128xf32>
    %12 = arith.truncf %11 : vector<16x128xf32> to vector<16x128xbf16>
    %c0_11 = arith.constant 0 : index
    %c0_12 = arith.constant 0 : index
    %13 = vector.load %arg4[%c0_11, %c0_12] : memref<8x16xbf16, #tpu.memory_space<vmem>>, vector<8x16xbf16>
    %cst_13 = arith.constant dense<0.000000e+00> : vector<8x128xf32>
    %14 = tpu.matmul %13, %12, %cst_13 {dimension_numbers = #tpu.dot_dimension_numbers<[1], [0], [0], [1], [0, 0, 1, 1], [], []>} : vector<8x16xbf16>, vector<16x128xbf16>, vector<8x128xf32> -> vector<8x128xf32>
    %15 = arith.truncf %14 : vector<8x128xf32> to vector<8x128xbf16>
    %c0_14 = arith.constant 0 : index
    %c0_15 = arith.constant 0 : index
    %16 = vector.load %arg5[%c0_14, %c0_15] : memref<128x64xbf16, #tpu.memory_space<vmem>>, vector<128x64xbf16>
    %cst_16 = arith.constant dense<0.000000e+00> : vector<8x64xf32>
    %17 = tpu.matmul %15, %16, %cst_16 {dimension_numbers = #tpu.dot_dimension_numbers<[1], [0], [0], [1], [0, 0, 1, 1], [], []>} : vector<8x128xbf16>, vector<128x64xbf16>, vector<8x64xf32> -> vector<8x64xf32>
    %18 = arith.truncf %17 : vector<8x64xf32> to vector<8x64xbf16>
    %c0_17 = arith.constant 0 : index
    %c0_18 = arith.constant 0 : index
    %c0_19 = arith.constant 0 : index
    %19 = vector.load %arg6[%c0_17, %c0_18, %c0_19] : memref<1x8x64xbf16, #tpu.memory_space<vmem>>, vector<1x8x64xbf16>
    %20 = vector.shape_cast %19 : vector<1x8x64xbf16> to vector<8x64xbf16>
    %21 = vector.shape_cast %18 : vector<8x64xbf16> to vector<1x8x64xbf16>
    tpu.vector_store %arg6[%c0_17, %c0_18, %c0_19], %21 {strides = array<i32>} : memref<1x8x64xbf16, #tpu.memory_space<vmem>>, vector<1x8x64xbf16>,
    return
  }
  func.func @transform_0(%arg0: i32) -> (i32, i32, i32) {
    %c0_i32 = arith.constant 0 : i32
    %c0_i32_0 = arith.constant 0 : i32
    %c0_i32_1 = arith.constant 0 : i32
    return %arg0, %c0_i32, %c0_i32_0 : i32, i32, i32
  }
  func.func @transform_1(%arg0: i32) -> (i32, i32) {
    %c0_i32 = arith.constant 0 : i32
    %c0_i32_0 = arith.constant 0 : i32
    %c0_i32_1 = arith.constant 0 : i32
    return %c0_i32, %c0_i32_0 : i32, i32
  }
  func.func @transform_2(%arg0: i32) -> (i32, i32) {
    %c0_i32 = arith.constant 0 : i32
    %c0_i32_0 = arith.constant 0 : i32
    %c0_i32_1 = arith.constant 0 : i32
    return %c0_i32, %c0_i32_0 : i32, i32
  }
  func.func @transform_3(%arg0: i32) -> (i32, i32) {
    %c0_i32 = arith.constant 0 : i32
    %c0_i32_0 = arith.constant 0 : i32
    %c0_i32_1 = arith.constant 0 : i32
    return %c0_i32, %c0_i32_0 : i32, i32
  }
  func.func @transform_4(%arg0: i32) -> (i32, i32) {
    %c0_i32 = arith.constant 0 : i32
    %c0_i32_0 = arith.constant 0 : i32
    %c0_i32_1 = arith.constant 0 : i32
    return %c0_i32, %c0_i32_0 : i32, i32
  }
  func.func @transform_5(%arg0: i32) -> (i32, i32, i32) {
    %c0_i32 = arith.constant 0 : i32
    %c0_i32_0 = arith.constant 0 : i32
    %c0_i32_1 = arith.constant 0 : i32
    return %arg0, %c0_i32, %c0_i32_0 : i32, i32, i32
  }
}

</mosaic_0001>

<bundles_post_ra>
// kernel: tile.8
= control target key start
LH: loop header
LB: loop body
LE: loop exit
PB: predicated region body
PF: predicated region fallthrough
CT: control target
= control target key end

     0   :  { %s28_s0 = inlined_call_operand.vmem [shape: f32[8], index: 0, kind: input, shape index: {}]   ;;  %s29_s1 = inlined_call_operand.vmem [shape: f32[16,8], index: 1, kind: output, shape index: {}]  }
   0x1   :  { %v4_v0 = vld [vmem:[%s28_s0] ss:$0 sm:$0xff] }
   0x2   :  { %5 = vst [vmem:[%s29_s1] sm:$0xff] %v4_v0  ;;  %8 = vst [vmem:[%s29_s1 + $0x8] sm:$0xff] %v4_v0 }

// kernel: tile.9
= control target key start
LH: loop header
LB: loop body
LE: loop exit
PB: predicated region body
PF: predicated region fallthrough
CT: control target
= control target key end

     0   :  { %s131_s10 = smov 120   ;;  %s132_s11 = smov 104   ;;  %vm3_vm0 = vcmask 64512   ;;  %vm9_vm1 = vcmask 1048512   ;;  %vm15_vm2 = vcmask 982912   ;;  %vm21_vm3 = vcmask 917312   ;;  %s207_s0 = inlined_call_operand.vmem [shape: f32[16,8], index: 0, kind: input, shape index: {}]   ;;  %s208_s1 = inlined_call_operand.vmem [shape: f32[1,128], index: 1, kind: output, shape index: {}]  }
   0x1   :  { %v101_v0 = vld [vmem:[%s207_s0 + $0xf] sm:$0x1]   ;;  %v103_v1 = vld [vmem:[%s207_s0 + $0xd] sm:$0x1]   ;;  %v102_v2 = vld [vmem:[%s207_s0 + $0xe] sm:$0x1]  }
   0x2   :  { %7 = vrot.lane.b32.xlu0 %v101_v0, %s131_s10  ;;  %19 = vrot.lane.b32.xlu1 %v103_v1, %s132_s11  ;;  %v104_v3 = vld [vmem:[%s207_s0 + $0xc] sm:$0x1]   ;;  %s133_s16 = smov 112   ;;  %s134_s17 = smov 96   ;;  %v105_v4 = vld [vmem:[%s207_s0 + $0xb] sm:$0x1]  }
   0x3   :  { %v106_v5 = vld [vmem:[%s207_s0 + $0xa] sm:$0x1]   ;;  %v2_v6 = vld [vmem:[%s207_s0] sm:$0x1]   ;;  %s135_s24 = smov 88   ;;  %s136_s25 = smov 80  }
   0x4   :  { %4 = vst.msk [vmem:[#allocation0] sm:$0x1] %vm3_vm0, %v2_v6   ;;  %v107_v7 = vld [vmem:[%s207_s0 + $0x9] sm:$0x1]   ;;  %v108_v8 = vld [vmem:[%s207_s0 + $0x8] sm:$0x1]  }
   0x5   :  { %s137_s30 = smov 72   ;;  %s138_s2 = smov 64   ;;  %v109_v9 = vld [vmem:[%s207_s0 + $0x7] sm:$0x1]   ;;  %v110_v10 = vld [vmem:[%s207_s0 + $0x6] sm:$0x1]  }
   0x6   :  { %13 = vrot.lane.b32.xlu0 %v102_v2, %s133_s16  ;;  %25 = vrot.lane.b32.xlu1 %v104_v3, %s134_s17  ;;  %s139_s7 = smov 56   ;;  %s140_s8 = smov 48   ;;  %v111_v11 = vld [vmem:[%s207_s0 + $0x5] sm:$0x1]   ;;  %v112_v12 = vld [vmem:[%s207_s0 + $0x4] sm:$0x1]  }
   0x7   :  { %s141_s13 = smov 40   ;;  %s142_s14 = smov 32   ;;  %v113_v13 = vld [vmem:[%s207_s0 + $0x3] sm:$0x1]   ;;  %v114_v14 = vld [vmem:[%s207_s0 + $0x2] sm:$0x1]  }
   0x8   :  { %s143_s19 = smov 24   ;;  %s144_s20 = smov 16   ;;  %v115_v15 = vld [vmem:[%s207_s0 + $0x1] sm:$0x1]   ;;  %vm27_vm4 = vcmask 851712   ;;  %vm33_vm5 = vcmask 786112  }
   0x9   :  { %s145_s0 = smov 8   ;;  %vm39_vm6 = vcmask 720512   ;;  %vm45_vm7 = vcmask 654912   ;;  %vm51_vm8 = vcmask 589312   ;;  %vm57_vm9 = vcmask 523712  }
   0xa   :  { %31 = vrot.lane.b32.xlu0 %v105_v4, %s135_s24  ;;  %37 = vrot.lane.b32.xlu1 %v106_v5, %s136_s25  ;;  %vm63_vm10 = vcmask 458112   ;;  %vm69_vm11 = vcmask 392512   ;;  %vm75_vm12 = vcmask 326912   ;;  %vm81_vm13 = vcmask 261312  }
   0xb   :  { %vm87_vm14 = vcmask 195712   ;;  %vm93_vm15 = vcmask 130112  }
   0xe   :  { %43 = vrot.lane.b32.xlu0 %v107_v7, %s137_s30  ;;  %49 = vrot.lane.b32.xlu1 %v108_v8, %s138_s2 }
  0x12   :  { %55 = vrot.lane.b32.xlu0 %v109_v9, %s139_s7  ;;  %61 = vrot.lane.b32.xlu1 %v110_v10, %s140_s8 }
  0x16   :  { %67 = vrot.lane.b32.xlu0 %v111_v11, %s141_s13  ;;  %73 = vrot.lane.b32.xlu1 %v112_v12, %s142_s14 }
  0x1a   :  { %79 = vrot.lane.b32.xlu0 %v113_v13, %s143_s19  ;;  %85 = vrot.lane.b32.xlu1 %v114_v14, %s144_s20 }
  0x1e   :  { %91 = vrot.lane.b32.xlu0 %v115_v15, %s145_s0 }
  0x74   :  { %v8_v16 = vpop.permute.xlu0 %7   ;;  %v20_v17 = vpop.permute.xlu1 %19  }
  0x75   :  { %10 = vst.msk [vmem:[#allocation0] sm:$0x1] %vm9_vm1, %v8_v16  }
  0x78   :  { %v14_v18 = vpop.permute.xlu0 %13   ;;  %v26_v19 = vpop.permute.xlu1 %25  }
  0x79   :  { %16 = vst.msk [vmem:[#allocation0] sm:$0x1] %vm15_vm2, %v14_v18  }
  0x7a   :  { %22 = vst.msk [vmem:[#allocation0] sm:$0x1] %vm21_vm3, %v20_v17  }
  0x7b   :  { %28 = vst.msk [vmem:[#allocation0] sm:$0x1] %vm27_vm4, %v26_v19  }
  0x7c   :  { %v32_v20 = vpop.permute.xlu0 %31   ;;  %v38_v21 = vpop.permute.xlu1 %37  }
  0x7d   :  { %34 = vst.msk [vmem:[#allocation0] sm:$0x1] %vm33_vm5, %v32_v20  }
  0x7e   :  { %40 = vst.msk [vmem:[#allocation0] sm:$0x1] %vm39_vm6, %v38_v21  }
  0x80   :  { %v44_v22 = vpop.permute.xlu0 %43   ;;  %v50_v23 = vpop.permute.xlu1 %49  }
  0x81   :  { %46 = vst.msk [vmem:[#allocation0] sm:$0x1] %vm45_vm7, %v44_v22  }
  0x82   :  { %52 = vst.msk [vmem:[#allocation0] sm:$0x1] %vm51_vm8, %v50_v23  }
  0x84   :  { %v56_v24 = vpop.permute.xlu0 %55   ;;  %v62_v25 = vpop.permute.xlu1 %61  }
  0x85   :  { %58 = vst.msk [vmem:[#allocation0] sm:$0x1] %vm57_vm9, %v56_v24  }
  0x86   :  { %64 = vst.msk [vmem:[#allocation0] sm:$0x1] %vm63_vm10, %v62_v25  }
  0x88   :  { %v68_v26 = vpop.permute.xlu0 %67   ;;  %v74_v27 = vpop.permute.xlu1 %73  }
  0x89   :  { %70 = vst.msk [vmem:[#allocation0] sm:$0x1] %vm69_vm11, %v68_v26  }
  0x8a   :  { %76 = vst.msk [vmem:[#allocation0] sm:$0x1] %vm75_vm12, %v74_v27  }
  0x8c   :  { %v80_v28 = vpop.permute.xlu0 %79   ;;  %v86_v29 = vpop.permute.xlu1 %85  }
  0x8d   :  { %82 = vst.msk [vmem:[#allocation0] sm:$0x1] %vm81_vm13, %v80_v28  }
  0x8e   :  { %88 = vst.msk [vmem:[#allocation0] sm:$0x1] %vm87_vm14, %v86_v29  }
  0x90   :  { %v92_v30 = vpop.permute.xlu0 %91  }
  0x91   :  { %94 = vst.msk [vmem:[#allocation0] sm:$0x1] %vm93_vm15, %v92_v30  }
  0x98   :  { %v98_v31 = vld [vmem:[#allocation0] sm:$0x1] }
  0x99   :  { %100 = vst [vmem:[%s208_s1] sm:$0x1] %v98_v31 }

// kernel: conv_blur_block.1
= control target key start
LH: loop header
LB: loop body
LE: loop exit
PB: predicated region body
PF: predicated region fallthrough
CT: control target
= control target key end

     0   :  { %s768_s18 = smov 0   ;;  %s860_s0 = inlined_call_operand.vmem [shape: bf16[2,18,64], index: 0, kind: input, shape index: {}]   ;;  %s861_s1 = inlined_call_operand.vmem [shape: bf16[192,128], index: 1, kind: input, shape index: {}]   ;;  %s862_s2 = inlined_call_operand.vmem [shape: f32[1,128], index: 2, kind: input, shape index: {}]   ;;  %s863_s3 = inlined_call_operand.vmem [shape: bf16[8,16], index: 3, kind: input, shape index: {}]   ;;  %s864_s4 = inlined_call_operand.vmem [shape: bf16[128,64], index: 4, kind: input, shape index: {}]   ;;  %s865_s5 = inlined_call_operand.vmem [shape: bf16[2,8,64], index: 5, kind: output, shape index: {}]  }
   0x1 LB: > { %s618_s19 = sadd.s32 4294967295, %s732_s18   ;;  %p622_p0 = scmp.ge.s32.totalorder %s732_s18, 1  ;;  %s732_s18 = sphi %s768_s18, %s15_s18  }
   0x2   : > { %p187_p1 = scmp.lt.s32.totalorder %s732_s18, 3 }
   0x4   : > { %p188_p2 = pnand %p622_p0, %p187_p1 }
   0x5   : > { %p214_p3 = scmp.lt.s32.totalorder (!%p188_p2), %s618_s19, 1  ;;  %v705_v0 = vld [vmem:[%s861_s1] sm:$0xff] (!%p188_p2)   ;;  %v734_v1 = vmov (!%p188_p2), 0   ;;  %v706_v2 = vld [vmem:[%s861_s1 + $0x8] sm:$0xff] (!%p188_p2)   ;;  %v707_v3 = vld [vmem:[%s861_s1 + $0x10] sm:$0xff] (!%p188_p2)   ;;  %vm254_vm1 = vcmask (!%p188_p2), 1046528  }
   0x6   : > { %191 = sbr.rel (%p188_p2) target bundleno = 795 (0x31b), region = 40  ;;  %368 = vmatprep.subr.bf16.mxu0 (!%p188_p2), %v734_v1  ;;  %vm236_vm0 = vsmask.f32 (!%p188_p2), 7424  ;;  %v708_v11 = vld [vmem:[%s861_s1 + $0x18] sm:$0xff] (!%p188_p2)   ;;  %v709_v15 = vld [vmem:[%s861_s1 + $0x20] sm:$0xff] (!%p188_p2)   ;;  %vm258_vm2 = vcmask (!%p188_p2), 523264  }
   0x7   : > { %369 = vmatpush1.bf16.msra.mxu0 (!%p188_p2), %v705_v0  ;;  %s735_s9 = smov (!%p188_p2), 64   ;;  %v710_v20 = vld [vmem:[%s861_s1 + $0x28] sm:$0xff] (!%p188_p2)   ;;  %v711_v23 = vld [vmem:[%s861_s1 + $0x30] sm:$0xff] (!%p188_p2)   ;;  %v712_v24 = vld [vmem:[%s861_s1 + $0x38] sm:$0xff] (!%p188_p2)   ;;  %v736_v31 = vmov (!%p188_p2), 0.0   ;;  %vm737_vm3 = vmmov (!%p188_p2), 0  }
   0x8   : > { %370 = vmatprep.subr.bf16.mxu0 (!%p188_p2), %v734_v1  ;;  %v713_v25 = vld [vmem:[%s861_s1 + $0x40] sm:$0xff] (!%p188_p2)   ;;  %v714_v26 = vld [vmem:[%s861_s1 + $0x48] sm:$0xff] (!%p188_p2)   ;;  %v715_v27 = vld [vmem:[%s861_s1 + $0x50] sm:$0xff] (!%p188_p2)   ;;  %664 = vmatprep.subr.bf16.mxu1 (!%p188_p2), %v736_v31  ;;  %vm413_vm4 = vcmask (!%p188_p2), 130048   ;;  %vm563_vm5 = vcmask (!%p188_p2), 519168  }
   0x9   : > { %v716_v28 = vld [vmem:[%s861_s1 + $0x58] sm:$0xff] (!%p188_p2)   ;;  %666 = vmatprep.mubr.msk.bf16.mxu1 (!%p188_p2), %vm737_vm3, %v736_v31  ;;  %v628_v32 = vld [vmem:[%s862_s2] ss:$0 sm:$0xff] (!%p188_p2)  ;;  %v719_v44 = vld [vmem:[%s864_s4 + $0x8] sm:$0xff] (!%p188_p2)  }
   0xa   : > { %v412_v42 = vld [vmem:[%s863_s3] sm:$0xf] (!%p188_p2)  ;;  %v720_v45 = vld [vmem:[%s864_s4 + $0x10] sm:$0xff] (!%p188_p2)   ;;  %v721_v46 = vld [vmem:[%s864_s4 + $0x18] sm:$0xff] (!%p188_p2)  }
   0xb   : > { %371 = vmatpush1.bf16.msra.mxu0 (!%p188_p2), %v706_v2  ;;  %v718_v43 = vld [vmem:[%s864_s4] sm:$0xff] (!%p188_p2)   ;;  %v723_v48 = vld [vmem:[%s864_s4 + $0x28] sm:$0xff] (!%p188_p2)   ;;  %v724_v49 = vld [vmem:[%s864_s4 + $0x30] sm:$0xff] (!%p188_p2)  }
   0xc   : > { %372 = vmatprep.subr.bf16.mxu0 (!%p188_p2), %v734_v1  ;;  %v722_v47 = vld [vmem:[%s864_s4 + $0x20] sm:$0xff] (!%p188_p2)   ;;  %v725_v50 = vld [vmem:[%s864_s4 + $0x38] sm:$0xff] (!%p188_p2)  }
   0xd   : > { %s867_s19 = smov (!%p214_p3, %s618_s19), 1 }
   0xe   : > { %s690_s24 = smul.u32 12, %s867_s19  ;;  %s624_s23 = sshll.u32 %s867_s19, 2 }
   0xf   : > { %373 = vmatpush1.bf16.msra.mxu0 %v707_v3  ;;  %s222_s26 = scalar_lea.vmem %s865_s5, %s624_s23 }
  0x10   : > { %s218_s27 = scalar_lea.vmem %s860_s0, %s690_s24  ;;  %374 = vmatprep.subr.bf16.mxu0 %v734_v1 }
  0x11   : > { %v224_v4 = vld [vmem:[%s218_s27] sm:$0xf]  ;;  %v225_v5 = vld [vmem:[%s218_s27 + $0x4] sm:$0xf] }
  0x12   : > { %v625_v6 = vcombine.low %v224_v4, %v225_v5  ;;  %v704_v7 = vld [vmem:[%s218_s27 + $0x8] ss:$0 sps:$4 sm:$0x11]   ;;  %v227_v16 = vld [vmem:[%s218_s27] sm:$0xe] }
  0x13   : > { %v245_v10 = vshll.u32 %v704_v7, 16  ;;  %375 = vmatpush1.bf16.msra.mxu0 %v708_v11  ;;  %v256_v17 = vrot.slane %v704_v7, 1  ;;  %v627_v18 = vcombine.low %v227_v16, %v225_v5 }
  0x14   : > { %v238_v8 = vshrl.u32 %v625_v6, 16  ;;  %v240_v9 = vshll.u32 %v625_v6, 16  ;;  %376 = vmatprep.subr.bf16.mxu0 %v734_v1 }
  0x15   : > { %v247_v13 = vrot.slane %v245_v10, 1  ;;  %v255_v21 = vrot.slane %v627_v18, 1 }
  0x16   : > { %v242_v12 = vrot.slane %v240_v9, 1 }
  0x17   : > { %377 = vmatpush1.bf16.msra.mxu0 %v709_v15  ;;  %v257_v22 = vsel %vm254_vm1, %v255_v21, %v256_v17 }
  0x18   : > { %v243_v14 = vor.u32 %v242_v12, %v238_v8  ;;  %378 = vmatprep.subr.bf16.mxu0 %v734_v1  ;;  %641 = vmatprep.mubr.msk.bf16.mxu0 %vm258_vm2, %v257_v22 }
  0x1a   : > { %v248_v19 = vsel %vm236_vm0, %v243_v14, %v247_v13 }
  0x1b   : > { %249 = vrot.lane.b32.xlu0 %v248_v19, %s735_s9  ;;  %379 = vmatpush1.bf16.msra.mxu0 %v710_v20 }
  0x1c   : > { %380 = vmatprep.subr.bf16.mxu0 %v734_v1 }
  0x1f   : > { %381 = vmatpush1.bf16.msra.mxu0 %v711_v23 }
  0x20   : > { %382 = vmatprep.subr.bf16.mxu0 %v734_v1 }
  0x23   : > { %383 = vmatpush1.bf16.msra.mxu0 %v712_v24 }
  0x24   : > { %384 = vmatprep.subr.bf16.mxu0 %v734_v1 }
  0x27   : > { %385 = vmatpush1.bf16.msra.mxu0 %v713_v25 }
  0x28   : > { %386 = vmatprep.subr.bf16.mxu0 %v734_v1 }
  0x2b   : > { %387 = vmatpush1.bf16.msra.mxu0 %v714_v26 }
  0x2c   : > { %388 = vmatprep.subr.bf16.mxu0 %v734_v1 }
  0x2f   : > { %389 = vmatpush1.bf16.msra.mxu0 %v715_v27 }
  0x30   : > { %390 = vmatprep.subr.bf16.mxu0 %v734_v1 }
  0x33   : > { %391 = vmatpush1.bf16.msra.mxu0 %v716_v28 }
  0x8d   : > { %v250_v29 = vpop.permute.xlu0 %249 }
  0x8e   : > { %v260_v30 = vsel %vm258_vm2, %v625_v6, %v250_v29 }
  0x8f   : > { %401 = vmatmul.mubr.bf16.vlgmr.msra.gmra.mrb[0].mxu0 %v260_v30 }
 0x162   : > { %v402_v33 = vpop.f32.mrb[0].mxu0 }
 0x163   : > { %v403_v34 = vadd.f32 %v628_v32, %v402_v33  ;;  %v404_v35 = vpop.f32.mrb[1].mxu0 }
 0x164   : > { %v405_v36 = vpop.f32.mrb[2].mxu0 }
 0x165   : > { %v406_v37 = vadd.f32 %v628_v32, %v405_v36  ;;  %v407_v38 = vpop.f32.mrb[3].mxu0  ;;  %v409_v39 = vmax.f32 %v403_v34, 0.0 }
 0x167   : > { %v410_v40 = vmax.f32 %v406_v37, 0.0 }
 0x169   : > { %v411_v41 = vpack.c.bf16 %v410_v40, %v409_v39 }
 0x16b   : > { %665 = vmatpush3.bf16.msra.mxu1 %v411_v41 }
 0x16c   : > { %670 = vmatprep.subr.bf16.mxu1 %v736_v31 }
 0x16e   : > { %667 = vmatmul.mubr.msk.bf16.vlgmr.msra.gmra.mrb[0].mxu1 %vm413_vm4, %v412_v42 }
 0x16f   : > { %671 = vmatpush3.bf16.msra.mxu1 %v718_v43  ;;  %686 = vmatprep.mubr.msk.bf16.mxu1 %vm737_vm3, %v736_v31 }
 0x170   : > { %672 = vmatprep.subr.bf16.mxu1 %v736_v31 }
 0x173   : > { %673 = vmatpush3.bf16.msra.mxu1 %v719_v44 }
 0x174   : > { %674 = vmatprep.subr.bf16.mxu1 %v736_v31 }
 0x177   : > { %675 = vmatpush3.bf16.msra.mxu1 %v720_v45 }
 0x178   : > { %676 = vmatprep.subr.bf16.mxu1 %v736_v31 }
 0x17b   : > { %677 = vmatpush3.bf16.msra.mxu1 %v721_v46 }
 0x17c   : > { %678 = vmatprep.subr.bf16.mxu1 %v736_v31 }
 0x17f   : > { %679 = vmatpush3.bf16.msra.mxu1 %v722_v47 }
 0x180   : > { %680 = vmatprep.subr.bf16.mxu1 %v736_v31 }
 0x183   : > { %681 = vmatpush3.bf16.msra.mxu1 %v723_v48 }
 0x184   : > { %682 = vmatprep.subr.bf16.mxu1 %v736_v31 }
 0x187   : > { %683 = vmatpush3.bf16.msra.mxu1 %v724_v49 }
 0x188   : > { %684 = vmatprep.subr.bf16.mxu1 %v736_v31 }
 0x18b   : > { %685 = vmatpush3.bf16.msra.mxu1 %v725_v50 }
 0x241   : > { %v451_v51 = vpop.f32.mrb[0].mxu1 }
 0x242   : > { %v457_v52 = vpack.c.bf16 %v451_v51, %v451_v51  ;;  %v668_v53 = vpop.f32.mrb[1].mxu1 }
 0x243   : > { %v454_v54 = vpop.f32.mrb[2].mxu1 }
 0x244   : > { %v669_v55 = vpop.f32.mrb[3].mxu1  ;;  %687 = vmatmul.mubr.bf16.vlgmr.msra.gmra.mrb[4].mxu1 %v457_v52 }
 0x317   : > { %v556_v56 = vpop.f32.mrb[4].mxu1 }
 0x318   : > { %v562_v57 = vpack.c.bf16 %v556_v56, %v556_v56  ;;  %v688_v58 = vpop.f32.mrb[5].mxu1 }
 0x319   : > { %v559_v59 = vpop.f32.mrb[6].mxu1 }
 0x31a   : > { %564 = vst.msk [vmem:[%s222_s26] sm:$0xf] %vm563_vm5, %v562_v57  ;;  %v689_v60 = vpop.f32.mrb[7].mxu1 }
 0x31b PF: > { %s15_s18 = sadd.s32 1, %s732_s18  }
 0x31c   : > { %p12_p4 = scmp.ge.s32.totalorder %s15_s18, 4  }
 0x31e   :  { %14 = sbr.rel (!%p12_p4) target bundleno = 1 (0x1), region = 70 }

</bundles_post_ra>
